<compile_context>
chip_gen: v7x
topology: tpu7x:2x2x1
jax: 0.10.0
libtpu: 0.0.40
codegen_flags: <defaults>
</compile_context>

<pallas_src>
import functools

import jax
import jax.numpy as jnp
from jax.experimental import pallas as pl
from jax.experimental.pallas import tpu as pltpu

EPS = 1e-5


def _ceil_to(n, m):
    return ((n + m - 1) // m) * m


# ---------------------------------------------------------------------------
# Fused MLP kernel: (Linear -> LayerNorm -> ReLU) * hidden_depth -> Linear
# ---------------------------------------------------------------------------
def _fused_mlp_kernel(*refs, hidden_depth: int, eps: float):
    # refs = (x_ref, [w, bgb] * hidden_depth, w_last, b_last, o_ref)
    #   w    : (d_prev, d)      in compute dtype (f32 or bf16)
    #   bgb  : (3, d) f32       rows = [bias, gamma, beta]
    #   b    : (1, d_out) f32   final-layer bias (no LN / activation)
    # All feature dims are at their TRUE widths -- no lane padding, no masks.
    x_ref = refs[0]
    o_ref = refs[-1]
    layer_refs = refs[1:-1]

    h = x_ref[...]                                   # (TB, d_in)
    idx = 0
    for _ in range(hidden_depth):
        w_ref, bgb_ref = layer_refs[idx:idx + 2]
        idx += 2
        y = jnp.dot(h.astype(w_ref.dtype), w_ref[...],
                    preferred_element_type=jnp.float32)
        y = y + bgb_ref[0:1, :]                      # bias (f32)
        mean = jnp.mean(y, axis=-1, keepdims=True)   # LN over true width
        diff = y - mean
        var = jnp.mean(diff * diff, axis=-1, keepdims=True)
        y = diff * jax.lax.rsqrt(var + eps)
        y = y * bgb_ref[1:2, :] + bgb_ref[2:3, :]    # gamma / beta (f32)
        h = jnp.maximum(y, 0.0)                      # f32 epilogue (v5e-safe)

    w_ref, b_ref = layer_refs[idx:idx + 2]           # final layer
    out = jnp.dot(h.astype(w_ref.dtype), w_ref[...],
                  preferred_element_type=jnp.float32) + b_ref[...]
    o_ref[...] = out.astype(o_ref.dtype)             # true-width store


# ---------------------------------------------------------------------------
# One-time parameter packing (hoisted out of the per-call path)
# ---------------------------------------------------------------------------
def prepare_params(layers, compute_dtype=jnp.bfloat16):
    """Cast weights to the matmul dtype and pack b/gamma/beta per hidden layer
    into a single (3, d) f32 array.  Call once; reuse across forward calls."""
    hidden_depth = len(layers) - 1
    packed = []
    for li, p in enumerate(layers):
        w = p["w"].astype(compute_dtype)
        if li < hidden_depth:
            bgb = jnp.concatenate(
                [p["b"], p["gamma"], p["beta"]], axis=0).astype(jnp.float32)
            packed += [w, bgb]
        else:
            packed += [w, p["b"].astype(jnp.float32)]
    return tuple(packed)


# ---------------------------------------------------------------------------
# Forward wrapper: single pallas_call over batch tiles (jitted)
# ---------------------------------------------------------------------------
@functools.partial(jax.jit, static_argnames=("tb", "eps"))
def mlp_forward(x, params, *, tb=1024, eps=EPS):
    """Forward of the whole MLP in one Pallas kernel.

    x: (B, d_in).  Pass x already in bf16 if you want the halved HBM read;
       otherwise it is read at its native dtype and cast on the VPU (free).
    params: tuple from prepare_params().
    """
    B, d_in = x.shape
    params = tuple(params)
    hidden_depth = len(params) // 2 - 1
    d_out = params[-1].shape[-1]

    # Batch tile selection: multiple of 8 sublanes (or the full batch when B
    # is tiny); when B <= tb split in two so both v7x TensorCores get rows.
    tb = _ceil_to(tb, 8)
    if B > tb:
        tb_eff = tb
    elif B >= 16:
        tb_eff = _ceil_to(pl.cdiv(B, 2), 8)
    else:
        tb_eff = B                      # full-extent sublane dim is legal
    grid = (pl.cdiv(B, tb_eff),)        # ragged tail handled by block masking

    in_specs = [pl.BlockSpec((tb_eff, d_in), lambda i: (i, 0))]
    # Weights / packed params: full-array blocks, VMEM-resident every step.
    in_specs += [pl.BlockSpec(p.shape, lambda i: (0, 0)) for p in params]

    cp = dict(dimension_semantics=("parallel",))
    if tb_eff >= 2048:
        cp["vmem_limit_bytes"] = 64 * 1024 * 1024

    kernel = functools.partial(
        _fused_mlp_kernel, hidden_depth=hidden_depth, eps=eps)
    return pl.pallas_call(
        kernel,
        out_shape=jax.ShapeDtypeStruct((B, d_out), jnp.float32),
        grid=grid,
        in_specs=in_specs,
        out_specs=pl.BlockSpec((tb_eff, d_out), lambda i: (i, 0)),
        compiler_params=pltpu.CompilerParams(**cp),
    )(x, *params)


# ---------------------------------------------------------------------------
# Parameter construction (deterministic, mirrors build_mlp init)
# ---------------------------------------------------------------------------
def _orthogonal(key, out_dim, in_dim, gain):
    """Orthogonal init like nn.init.orthogonal_ (shape [out, in]), scaled by gain."""
    n, m = out_dim, in_dim
    a = jax.random.normal(key, (max(n, m), min(n, m)), dtype=jnp.float32)
    q, r = jnp.linalg.qr(a)
    q = q * jnp.sign(jnp.diag(r))
    if n < m:
        q = q.T
    return gain * q[:n, :m]


def make_mlp_params(key, input_dim, hidden_dim, output_dim, hidden_depth):
    """List of per-layer dicts: {'w' [in,out], 'b', 'gamma', 'beta', 'ln', 'act'}."""
    gain = jnp.sqrt(2.0)  # torch calculate_gain('relu')
    dims = [input_dim] + [hidden_dim] * hidden_depth + [output_dim]
    layers = []
    for li in range(len(dims) - 1):
        key, sub = jax.random.split(key)
        din, dout = dims[li], dims[li + 1]
        w = _orthogonal(sub, dout, din, gain).T          # -> [in, out]
        b = jnp.zeros((1, dout), jnp.float32)            # bias_init='zeros'
        gamma = jnp.ones((1, dout), jnp.float32)
        beta = jnp.zeros((1, dout), jnp.float32)
        is_hidden = li < len(dims) - 2
        layers.append(dict(w=w, b=b, gamma=gamma, beta=beta,
                           ln=is_hidden, act=is_hidden))
    return layers


# ---------------------------------------------------------------------------
# Pure-JAX reference (torch Linear + LayerNorm + ReLU semantics)
# ---------------------------------------------------------------------------
def mlp_reference(x, layers, eps=EPS, compute_dtype=jnp.float32):
    y = x
    for p in layers:
        y = jnp.dot(y.astype(compute_dtype), p["w"].astype(compute_dtype),
                    preferred_element_type=jnp.float32) + p["b"]
        if p["ln"]:
            mean = jnp.mean(y, axis=-1, keepdims=True)
            var = jnp.mean(jnp.square(y - mean), axis=-1, keepdims=True)
            y = (y - mean) * jax.lax.rsqrt(var + eps)
            y = y * p["gamma"] + p["beta"]
        if p["act"]:
            y = jnp.maximum(y, 0.0)
    return y


if __name__ == "__main__":
    key = jax.random.PRNGKey(0)
    k_param, k_x = jax.random.split(key)

    INPUT_DIM, HIDDEN_DIM, OUTPUT_DIM, HIDDEN_DEPTH = 32, 64, 16, 2
    BATCH = 100   # ragged (not a multiple of the tile) -> exercises tail masking

    layers = make_mlp_params(k_param, INPUT_DIM, HIDDEN_DIM, OUTPUT_DIM,
                             HIDDEN_DEPTH)
    x = jax.random.normal(k_x, (BATCH, INPUT_DIM), dtype=jnp.float32)

    # f32 matmul-input path: tight correctness check against the reference.
    params_f32 = prepare_params(layers, compute_dtype=jnp.float32)
    out = jax.block_until_ready(mlp_forward(x, params_f32))
    ref = mlp_reference(x, layers, compute_dtype=jnp.float32)
    assert out.shape == (BATCH, OUTPUT_DIM), out.shape
    assert jnp.allclose(out, ref, atol=5e-4, rtol=5e-4), \
        float(jnp.max(jnp.abs(out - ref)))

    # bf16 matmul-input path (default in production: halves x / weight HBM
    # bytes on v5e/v6e/v7x); LN/ReLU epilogue stays f32.
    params_bf16 = prepare_params(layers, compute_dtype=jnp.bfloat16)
    out_bf16 = jax.block_until_ready(
        mlp_forward(x.astype(jnp.bfloat16), params_bf16))
    ref_bf16 = mlp_reference(x, layers, compute_dtype=jnp.bfloat16)
    assert jnp.allclose(out_bf16, ref_bf16, atol=5e-3, rtol=5e-3), \
        float(jnp.max(jnp.abs(out_bf16 - ref_bf16)))

    print("KERNEL_OK")
</pallas_src>

<mosaic_0001>
module attributes {stable_mosaic.version = 11 : i64} {
  func.func @_fused_mlp_kernel(%arg0: i32, %arg1: memref<56x32xf32, #tpu.memory_space<vmem>>, %arg2: memref<32x64xf32, #tpu.memory_space<vmem>>, %arg3: memref<3x64xf32, #tpu.memory_space<vmem>>, %arg4: memref<64x64xf32, #tpu.memory_space<vmem>>, %arg5: memref<3x64xf32, #tpu.memory_space<vmem>>, %arg6: memref<64x16xf32, #tpu.memory_space<vmem>>, %arg7: memref<1x16xf32, #tpu.memory_space<vmem>>, %arg8: memref<56x16xf32, #tpu.memory_space<vmem>>) attributes {dimension_semantics = [#tpu.dimension_semantics<parallel>], iteration_bounds = array<i64: 2>, scalar_prefetch = 0 : i64, scratch_operands = 0 : i64, tpu.core_type = #tpu.core_type<tc>, window_params = [{transform_indices = @transform_0, window_bounds = array<i64: 56, 32>}, {pipeline_mode = #tpu.pipeline_mode<synchronous>, transform_indices = @transform_1, window_bounds = array<i64: 32, 64>}, {pipeline_mode = #tpu.pipeline_mode<synchronous>, transform_indices = @transform_2, window_bounds = array<i64: 3, 64>}, {pipeline_mode = #tpu.pipeline_mode<synchronous>, transform_indices = @transform_3, window_bounds = array<i64: 64, 64>}, {pipeline_mode = #tpu.pipeline_mode<synchronous>, transform_indices = @transform_4, window_bounds = array<i64: 3, 64>}, {pipeline_mode = #tpu.pipeline_mode<synchronous>, transform_indices = @transform_5, window_bounds = array<i64: 64, 16>}, {pipeline_mode = #tpu.pipeline_mode<synchronous>, transform_indices = @transform_6, window_bounds = array<i64: 1, 16>}, {transform_indices = @transform_7, window_bounds = array<i64: 56, 16>}]} {
    %c0 = arith.constant 0 : index
    %c0_0 = arith.constant 0 : index
    %0 = vector.load %arg1[%c0, %c0_0] : memref<56x32xf32, #tpu.memory_space<vmem>>, vector<56x32xf32>
    %c0_1 = arith.constant 0 : index
    %c0_2 = arith.constant 0 : index
    %1 = vector.load %arg2[%c0_1, %c0_2] : memref<32x64xf32, #tpu.memory_space<vmem>>, vector<32x64xf32>
    %cst = arith.constant dense<0.000000e+00> : vector<56x64xf32>
    %2 = tpu.matmul %0, %1, %cst {dimension_numbers = #tpu.dot_dimension_numbers<[1], [0], [0], [1], [0, 0, 1, 1], [], []>} : vector<56x32xf32>, vector<32x64xf32>, vector<56x64xf32> -> vector<56x64xf32>
    %c0_3 = arith.constant 0 : index
    %c0_4 = arith.constant 0 : index
    %3 = vector.load %arg3[%c0_3, %c0_4] : memref<3x64xf32, #tpu.memory_space<vmem>>, vector<1x64xf32>
    %4 = vector.broadcast %3 : vector<1x64xf32> to vector<56x64xf32>
    %5 = arith.addf %2, %4 : vector<56x64xf32>
    %cst_5 = arith.constant dense<0.000000e+00> : vector<56xf32>
    %6 = vector.multi_reduction <add>, %5, %cst_5 [1] : vector<56x64xf32> to vector<56xf32>
    %7 = vector.shape_cast %6 : vector<56xf32> to vector<56x1xf32>
    %cst_6 = arith.constant 6.400000e+01 : f32
    %8 = vector.broadcast %cst_6 : f32 to vector<56x1xf32>
    %9 = arith.divf %7, %8 : vector<56x1xf32>
    %10 = vector.broadcast %9 : vector<56x1xf32> to vector<56x64xf32>
    %11 = arith.subf %5, %10 : vector<56x64xf32>
    %12 = arith.mulf %11, %11 : vector<56x64xf32>
    %cst_7 = arith.constant dense<0.000000e+00> : vector<56xf32>
    %13 = vector.multi_reduction <add>, %12, %cst_7 [1] : vector<56x64xf32> to vector<56xf32>
    %14 = vector.shape_cast %13 : vector<56xf32> to vector<56x1xf32>
    %cst_8 = arith.constant 6.400000e+01 : f32
    %15 = vector.broadcast %cst_8 : f32 to vector<56x1xf32>
    %16 = arith.divf %14, %15 : vector<56x1xf32>
    %cst_9 = arith.constant 9.99999974E-6 : f32
    %17 = vector.broadcast %cst_9 : f32 to vector<56x1xf32>
    %18 = arith.addf %16, %17 : vector<56x1xf32>
    %19 = math.rsqrt %18 : vector<56x1xf32>
    %20 = vector.broadcast %19 : vector<56x1xf32> to vector<56x64xf32>
    %21 = arith.mulf %11, %20 : vector<56x64xf32>
    %c1 = arith.constant 1 : index
    %c0_10 = arith.constant 0 : index
    %22 = vector.load %arg3[%c1, %c0_10] : memref<3x64xf32, #tpu.memory_space<vmem>>, vector<1x64xf32>
    %23 = vector.broadcast %22 : vector<1x64xf32> to vector<56x64xf32>
    %24 = arith.mulf %21, %23 : vector<56x64xf32>
    %c2 = arith.constant 2 : index
    %c0_11 = arith.constant 0 : index
    %25 = vector.load %arg3[%c2, %c0_11] : memref<3x64xf32, #tpu.memory_space<vmem>>, vector<1x64xf32>
    %26 = vector.broadcast %25 : vector<1x64xf32> to vector<56x64xf32>
    %27 = arith.addf %24, %26 : vector<56x64xf32>
    %cst_12 = arith.constant 0.000000e+00 : f32
    %28 = vector.broadcast %cst_12 : f32 to vector<56x64xf32>
    %29 = arith.maximumf %27, %28 : vector<56x64xf32>
    %c0_13 = arith.constant 0 : index
    %c0_14 = arith.constant 0 : index
    %30 = vector.load %arg4[%c0_13, %c0_14] : memref<64x64xf32, #tpu.memory_space<vmem>>, vector<64x64xf32>
    %cst_15 = arith.constant dense<0.000000e+00> : vector<56x64xf32>
    %31 = tpu.matmul %29, %30, %cst_15 {dimension_numbers = #tpu.dot_dimension_numbers<[1], [0], [0], [1], [0, 0, 1, 1], [], []>} : vector<56x64xf32>, vector<64x64xf32>, vector<56x64xf32> -> vector<56x64xf32>
    %c0_16 = arith.constant 0 : index
    %c0_17 = arith.constant 0 : index
    %32 = vector.load %arg5[%c0_16, %c0_17] : memref<3x64xf32, #tpu.memory_space<vmem>>, vector<1x64xf32>
    %33 = vector.broadcast %32 : vector<1x64xf32> to vector<56x64xf32>
    %34 = arith.addf %31, %33 : vector<56x64xf32>
    %cst_18 = arith.constant dense<0.000000e+00> : vector<56xf32>
    %35 = vector.multi_reduction <add>, %34, %cst_18 [1] : vector<56x64xf32> to vector<56xf32>
    %36 = vector.shape_cast %35 : vector<56xf32> to vector<56x1xf32>
    %cst_19 = arith.constant 6.400000e+01 : f32
    %37 = vector.broadcast %cst_19 : f32 to vector<56x1xf32>
    %38 = arith.divf %36, %37 : vector<56x1xf32>
    %39 = vector.broadcast %38 : vector<56x1xf32> to vector<56x64xf32>
    %40 = arith.subf %34, %39 : vector<56x64xf32>
    %41 = arith.mulf %40, %40 : vector<56x64xf32>
    %cst_20 = arith.constant dense<0.000000e+00> : vector<56xf32>
    %42 = vector.multi_reduction <add>, %41, %cst_20 [1] : vector<56x64xf32> to vector<56xf32>
    %43 = vector.shape_cast %42 : vector<56xf32> to vector<56x1xf32>
    %cst_21 = arith.constant 6.400000e+01 : f32
    %44 = vector.broadcast %cst_21 : f32 to vector<56x1xf32>
    %45 = arith.divf %43, %44 : vector<56x1xf32>
    %cst_22 = arith.constant 9.99999974E-6 : f32
    %46 = vector.broadcast %cst_22 : f32 to vector<56x1xf32>
    %47 = arith.addf %45, %46 : vector<56x1xf32>
    %48 = math.rsqrt %47 : vector<56x1xf32>
    %49 = vector.broadcast %48 : vector<56x1xf32> to vector<56x64xf32>
    %50 = arith.mulf %40, %49 : vector<56x64xf32>
    %c1_23 = arith.constant 1 : index
    %c0_24 = arith.constant 0 : index
    %51 = vector.load %arg5[%c1_23, %c0_24] : memref<3x64xf32, #tpu.memory_space<vmem>>, vector<1x64xf32>
    %52 = vector.broadcast %51 : vector<1x64xf32> to vector<56x64xf32>
    %53 = arith.mulf %50, %52 : vector<56x64xf32>
    %c2_25 = arith.constant 2 : index
    %c0_26 = arith.constant 0 : index
    %54 = vector.load %arg5[%c2_25, %c0_26] : memref<3x64xf32, #tpu.memory_space<vmem>>, vector<1x64xf32>
    %55 = vector.broadcast %54 : vector<1x64xf32> to vector<56x64xf32>
    %56 = arith.addf %53, %55 : vector<56x64xf32>
    %cst_27 = arith.constant 0.000000e+00 : f32
    %57 = vector.broadcast %cst_27 : f32 to vector<56x64xf32>
    %58 = arith.maximumf %56, %57 : vector<56x64xf32>
    %c0_28 = arith.constant 0 : index
    %c0_29 = arith.constant 0 : index
    %59 = vector.load %arg6[%c0_28, %c0_29] : memref<64x16xf32, #tpu.memory_space<vmem>>, vector<64x16xf32>
    %cst_30 = arith.constant dense<0.000000e+00> : vector<56x16xf32>
    %60 = tpu.matmul %58, %59, %cst_30 {dimension_numbers = #tpu.dot_dimension_numbers<[1], [0], [0], [1], [0, 0, 1, 1], [], []>} : vector<56x64xf32>, vector<64x16xf32>, vector<56x16xf32> -> vector<56x16xf32>
    %c0_31 = arith.constant 0 : index
    %c0_32 = arith.constant 0 : index
    %61 = vector.load %arg7[%c0_31, %c0_32] : memref<1x16xf32, #tpu.memory_space<vmem>>, vector<1x16xf32>
    %62 = vector.broadcast %61 : vector<1x16xf32> to vector<56x16xf32>
    %63 = arith.addf %60, %62 : vector<56x16xf32>
    %c0_33 = arith.constant 0 : index
    %c0_34 = arith.constant 0 : index
    %64 = vector.load %arg8[%c0_33, %c0_34] : memref<56x16xf32, #tpu.memory_space<vmem>>, vector<56x16xf32>
    tpu.vector_store %arg8[%c0_33, %c0_34], %63 {strides = array<i32>} : memref<56x16xf32, #tpu.memory_space<vmem>>, vector<56x16xf32>,
    return
  }
  func.func @transform_0(%arg0: i32) -> (i32, i32) {
    %c0_i32 = arith.constant 0 : i32
    %c0_i32_0 = arith.constant 0 : i32
    return %arg0, %c0_i32 : i32, i32
  }
  func.func @transform_1(%arg0: i32) -> (i32, i32) {
    %c0_i32 = arith.constant 0 : i32
    %c0_i32_0 = arith.constant 0 : i32
    %c0_i32_1 = arith.constant 0 : i32
    return %c0_i32, %c0_i32_0 : i32, i32
  }
  func.func @transform_2(%arg0: i32) -> (i32, i32) {
    %c0_i32 = arith.constant 0 : i32
    %c0_i32_0 = arith.constant 0 : i32
    %c0_i32_1 = arith.constant 0 : i32
    return %c0_i32, %c0_i32_0 : i32, i32
  }
  func.func @transform_3(%arg0: i32) -> (i32, i32) {
    %c0_i32 = arith.constant 0 : i32
    %c0_i32_0 = arith.constant 0 : i32
    %c0_i32_1 = arith.constant 0 : i32
    return %c0_i32, %c0_i32_0 : i32, i32
  }
  func.func @transform_4(%arg0: i32) -> (i32, i32) {
    %c0_i32 = arith.constant 0 : i32
    %c0_i32_0 = arith.constant 0 : i32
    %c0_i32_1 = arith.constant 0 : i32
    return %c0_i32, %c0_i32_0 : i32, i32
  }
  func.func @transform_5(%arg0: i32) -> (i32, i32) {
    %c0_i32 = arith.constant 0 : i32
    %c0_i32_0 = arith.constant 0 : i32
    %c0_i32_1 = arith.constant 0 : i32
    return %c0_i32, %c0_i32_0 : i32, i32
  }
  func.func @transform_6(%arg0: i32) -> (i32, i32) {
    %c0_i32 = arith.constant 0 : i32
    %c0_i32_0 = arith.constant 0 : i32
    %c0_i32_1 = arith.constant 0 : i32
    return %c0_i32, %c0_i32_0 : i32, i32
  }
  func.func @transform_7(%arg0: i32) -> (i32, i32) {
    %c0_i32 = arith.constant 0 : i32
    %c0_i32_0 = arith.constant 0 : i32
    return %arg0, %c0_i32 : i32, i32
  }
}

</mosaic_0001>

<bundles_post_ra>
// kernel: mlp_forward.1
= control target key start
LH: loop header
LB: loop body
LE: loop exit
PB: predicated region body
PF: predicated region fallthrough
CT: control target
= control target key end

     0   :  { %s1683_s24 = smov 0   ;;  %s1685_s25 = smov 0   ;;  %s2047_s0 = inlined_call_operand.vmem [shape: f32[100,32], index: 0, kind: input, shape index: {}]   ;;  %s2048_s1 = inlined_call_operand.vmem [shape: f32[32,64], index: 1, kind: input, shape index: {}]   ;;  %s2049_s2 = inlined_call_operand.vmem [shape: f32[3,64], index: 2, kind: input, shape index: {}]   ;;  %s2050_s3 = inlined_call_operand.vmem [shape: f32[64,64], index: 3, kind: input, shape index: {}]   ;;  %s2051_s4 = inlined_call_operand.vmem [shape: f32[3,64], index: 4, kind: input, shape index: {}]   ;;  %s2052_s5 = inlined_call_operand.vmem [shape: f32[64,16], index: 5, kind: input, shape index: {}]   ;;  %s2053_s6 = inlined_call_operand.vmem [shape: f32[1,16], index: 6, kind: input, shape index: {}]   ;;  %s2054_s7 = inlined_call_operand.vmem [shape: f32[100,16], index: 7, kind: output, shape index: {}]  }
   0x1   :  { %s1687_s26 = smov 0  }
   0x2 LB: > { %s1696_s27 = sadd.s32 4294967295, %s1606_s26   ;;  %s1698_s28 = sadd.s32 1, %s1606_s26   ;;  %s1606_s26 = sphi %s1687_s26, %s2061_s26   ;;  %s1602_s25 = sphi %s1685_s25, %s2060_s25   ;;  %s1598_s24 = sphi %s1683_s24, %s2059_s24  }
   0x3   : > { %s173_s29 = ssub.s32 %s1606_s26, %s1698_s28  ;;  %s176_s30 = sadd.s32 1, %s1602_s25 }
   0x4   : > { %p174_p0 = scmp.eq.s32.totalorder %s173_s29, 0  ;;  %p186_p1 = scmp.ne.s32.totalorder %s1602_s25, %s1598_s24 }
   0x5   : > { %p187_p2 = scmp.eq.s32.totalorder %s1696_s27, 1  ;;  %p1206_p3 = scmp.ge.s32.totalorder %s1606_s26, 1 }
   0x6   : > { %s1706_s8 = scalar_select %p174_p0, %s1602_s25, %s176_s30  }
   0x7   : > { %p1708_p4 = por %p187_p2, %p186_p1  ;;  %p246_p5 = scmp.lt.s32.totalorder %s1606_s26, 3 }
   0x9   : > { %p247_p6 = pnand %p1206_p3, %p246_p5 }
   0xa   : > { %v307_v0 = vld [vmem:[%s2048_s1] sm:$0xff] (!%p247_p6)  ;;  %v308_v1 = vld [vmem:[%s2048_s1 + $0x8] sm:$0xff] (!%p247_p6)  ;;  %v309_v2 = vld [vmem:[%s2048_s1 + $0x10] sm:$0xff] (!%p247_p6)  ;;  %v1640_v3 = vmov (!%p247_p6), 0.0|0.0   ;;  %s1727_s18 = smul.u32 (!%p247_p6), 7, %s1696_s27  ;;  %vm1641_vm0 = vmmov (!%p247_p6), 0  }
   0xb   : > { %250 = sbr.rel (%p247_p6) target bundleno = 1381 (0x565), region = 48  ;;  %1393 = vmatprep.subr.bf16.mxu0 (!%p247_p6), %v1640_v3  ;;  %v1394_v4 = vpack.c.bf16 (!%p247_p6), %v308_v1, %v307_v0  ;;  %1423 = vmatprep.subr.bf16.mxu1 (!%p247_p6), %v1640_v3  ;;  %v310_v5 = vld [vmem:[%s2048_s1 + $0x18] sm:$0xff] (!%p247_p6)  ;;  %v1642_v6 = vmov (!%p247_p6), 0.0   ;;  %vm316_vm1 = vcmask (!%p247_p6), 261120   ;;  %v1208_v15 = vld [vmem:[%s2049_s2] ss:$0 sm:$0xff] (!%p247_p6) }
   0xc   : > { %1298 = vmatprep.mubr.msk.f32.mxu0 (!%p247_p6), %vm1641_vm0, %v1642_v6  ;;  %1310 = vmatprep.mubr.msk.f32.mxu1 (!%p247_p6), %vm1641_vm0, %v1642_v6  ;;  %v1397_v7 = vpack.c.bf16 (!%p247_p6), %v310_v5, %v309_v2  ;;  %p286_p7 = scmp.lt.s32.totalorder (!%p247_p6), %s1727_s18, 12  ;;  %vm438_vm2 = vcmask (!%p247_p6), 523264   ;;  %vm954_vm3 = vcmask (!%p247_p6), 130048  }
   0xd   : > { %1395 = vmatpush3.bf16.msra.mxu0 (!%p247_p6), %v1394_v4  ;;  %1425 = vmatpush3.bf16.msra.mxu1 (!%p247_p6), %v1394_v4 }
   0xe   : > { %1396 = vmatprep.subr.bf16.mxu0 (!%p247_p6), %v1640_v3  ;;  %1424 = vmatprep.subr.bf16.mxu1 (!%p247_p6), %v1640_v3 }
  0x11   : > { %1398 = vmatpush3.bf16.msra.mxu0 (!%p247_p6), %v1397_v7  ;;  %1426 = vmatpush3.bf16.msra.mxu1 (!%p247_p6), %v1397_v7 }
  0x12   : > { %s287_s19 = scalar_select %p286_p7, %s1727_s18, 12  ;;  %1399 = vmatprep.subr.bf16.mxu1 %v1640_v3  ;;  %1411 = vmatprep.subr.bf16.mxu0 %v1640_v3 }
  0x13   : > { %s1248_s29 = smul.u32 (%p1708_p4), 56, %s1696_s27 }
  0x14   : > { %s1207_s20 = sshll.u32 %s287_s19, 3 }
  0x15   : > { %s289_s23 = scalar_lea.vmem %s2047_s0, %s1207_s20  ;;  %s278_s20 = sand.u32 1, %s1598_s24  }
  0x16   : > { %v300_v8 = vld [vmem:[%s289_s23] sm:$0xff]  ;;  %v301_v10 = vld [vmem:[%s289_s23 + $0x8] sm:$0xff]  ;;  %v302_v12 = vld [vmem:[%s289_s23 + $0x10] sm:$0xff]  ;;  %s1427_s21 = smul.u32 56, %s278_s20  ;;  %s970_s24 = ssub.s32 (%p1708_p4), 13, %s1727_s18 }
  0x17   : > { %v304_v9 = vld [vmem:[%s289_s23 + $0x20] sm:$0xff]  ;;  %1299 = vmatmul.mubr.msk.f32.vlgmr.msra.gmra.mrb[0].mxu0 %vm316_vm1, %v300_v8  ;;  %v305_v11 = vld [vmem:[%s289_s23 + $0x28] sm:$0xff]  ;;  %v306_v13 = vld [vmem:[%s289_s23 + $0x30] sm:$0xff]  ;;  %p971_p8 = scmp.lt.s32.totalorder (%p1708_p4), %s970_s24, 7  ;;  %s1998_s11 = scalar_lea.vmem (%p1708_p4), %s2054_s7, %s1248_s29  }
  0x18   : > { %1311 = vmatmul.mubr.msk.f32.vlgmr.msra.gmra.mrb[0].mxu1 %vm316_vm1, %v304_v9  ;;  %1301 = vmatprep.mubr.msk.f32.mxu0 %vm1641_vm0, %v1642_v6  ;;  %v303_v14 = vld [vmem:[%s289_s23 + $0x18] sm:$0xff]  ;;  %s1975_s26 = scalar_lea.vmem [#allocation2], %s1427_s21  }
  0x19   : > { %1313 = vmatprep.mubr.msk.f32.mxu1 %vm1641_vm0, %v1642_v6 }
  0x1b   : > { %1302 = vmatmul.mubr.msk.f32.gmra.mrb[2].mxu0 %vm316_vm1, %v301_v10 }
  0x1c   : > { %1314 = vmatmul.mubr.msk.f32.gmra.mrb[2].mxu1 %vm316_vm1, %v305_v11  ;;  %1304 = vmatprep.mubr.msk.f32.mxu0 %vm1641_vm0, %v1642_v6 }
  0x1d   : > { %1316 = vmatprep.mubr.msk.f32.mxu1 %vm1641_vm0, %v1642_v6 }
  0x1f   : > { %1305 = vmatmul.mubr.msk.f32.gmra.mrb[4].mxu0 %vm316_vm1, %v302_v12 }
  0x20   : > { %1317 = vmatmul.mubr.msk.f32.gmra.mrb[4].mxu1 %vm316_vm1, %v306_v13  ;;  %1307 = vmatprep.mubr.msk.f32.mxu0 %vm1641_vm0, %v1642_v6 }
  0x21   : > { %1335 = vmatprep.mubr.msk.f32.mxu1 %vm1641_vm0, %v1642_v6 }
  0x23   : > { %1308 = vmatmul.mubr.msk.f32.gmra.mrb[6].mxu0 %vm316_vm1, %v303_v14 }
  0x24   : > { %1372 = vmatprep.mubr.msk.f32.mxu0 %vm1641_vm0, %v1642_v6 }
  0xea   : > { %v404_v16 = vpop.f32.mrb[0].mxu0 }
  0xeb   : > { %v424_v17 = vpop.f32.mrb[0].mxu1  ;;  %v405_v18 = vadd.f32 %v1208_v15, %v404_v16  ;;  %v1300_v19 = vpop.f32.mrb[1].mxu0 }
  0xec   : > { %v1312_v20 = vpop.f32.mrb[1].mxu1  ;;  %v425_v26 = vadd.f32 %v1208_v15, %v424_v17  ;;  %v562_v17 = vld [vmem:[%s2050_s3] sm:$0xff] }
  0xed   : > { %v439_v21 = vsel %vm438_vm2, %v405_v18, 0.0  ;;  %v564_v20 = vld [vmem:[%s2050_s3 + $0x10] sm:$0xff] }
  0xee   : > { %440 = vadd.xlane.f32.xlu0 %v439_v21  ;;  %v409_v22 = vpop.f32.mrb[2].mxu0  ;;  %v451_v34 = vsel %vm438_vm2, %v425_v26, 0.0  ;;  %v565_v21 = vld [vmem:[%s2050_s3 + $0x18] sm:$0xff] }
  0xef   : > { %v429_v23 = vpop.f32.mrb[2].mxu1  ;;  %v410_v24 = vadd.f32 %v1208_v15, %v409_v22  ;;  %v1303_v25 = vpop.f32.mrb[3].mxu0  ;;  %v1403_v22 = vpack.c.bf16 %v565_v21, %v564_v20 }
  0xf0   : > { %v1315_v27 = vpop.f32.mrb[3].mxu1  ;;  %v430_v38 = vadd.f32 %v1208_v15, %v429_v23  ;;  %v566_v23 = vld [vmem:[%s2050_s3 + $0x20] sm:$0xff] }
  0xf1   : > { %v442_v28 = vsel %vm438_vm2, %v410_v24, 0.0  ;;  %v569_v27 = vld [vmem:[%s2050_s3 + $0x38] sm:$0xff] }
  0xf2   : > { %443 = vadd.xlane.f32.xlu0 %v442_v28  ;;  %v414_v29 = vpop.f32.mrb[4].mxu0  ;;  %v454_v43 = vsel %vm438_vm2, %v430_v38, 0.0 }
  0xf3   : > { %v434_v30 = vpop.f32.mrb[4].mxu1  ;;  %v415_v31 = vadd.f32 %v1208_v15, %v414_v29  ;;  %v1306_v32 = vpop.f32.mrb[5].mxu0 }
  0xf4   : > { %v435_v33 = vadd.f32 %v1208_v15, %v434_v30  ;;  %v1318_v35 = vpop.f32.mrb[5].mxu1 }
  0xf5   : > { %v445_v36 = vsel %vm438_vm2, %v415_v31, 0.0 }
  0xf6   : > { %452 = vadd.xlane.f32.xlu0 %v451_v34  ;;  %446 = vadd.xlane.f32.xlu1 %v445_v36  ;;  %v419_v37 = vpop.f32.mrb[6].mxu0  ;;  %v457_v41 = vsel %vm438_vm2, %v435_v33, 0.0 }
  0xf7   : > { %v420_v39 = vadd.f32 %v1208_v15, %v419_v37  ;;  %v1309_v40 = vpop.f32.mrb[7].mxu0 }
  0xf9   : > { %v448_v42 = vsel %vm438_vm2, %v420_v39, 0.0 }
  0xfa   : > { %458 = vadd.xlane.f32.xlu0 %v457_v41  ;;  %449 = vadd.xlane.f32.xlu1 %v448_v42 }
  0xfe   : > { %455 = vadd.xlane.f32.xlu1 %v454_v43  ;;  %v1216_v43 = vld [vmem:[%s2049_s2 + $0x1] ss:$0 sm:$0xff] }
 0x17b   : > { %v441_v44 = vpop.xlane.xlu0 %440 }
 0x17c   : > { %v461_v45 = vmul.f32 0.015625, %v441_v44 }
 0x17e   : > { %v1773_v46 = vsub.f32 %v405_v18, %v461_v45  ;;  %v563_v18 = vld [vmem:[%s2050_s3 + $0x8] sm:$0xff] }
 0x17f   : > { %v444_v47 = vpop.xlane.xlu0 %443  ;;  %v1400_v19 = vpack.c.bf16 %v563_v18, %v562_v17 }
 0x180   : > { %v462_v48 = vmul.f32 0.015625, %v444_v47  ;;  %v475_v49 = vmul.f32 %v1773_v46, %v1773_v46 }
 0x181   : > { %1401 = vmatpush3.bf16.msra.mxu1 %v1400_v19 }
 0x182   : > { %v1777_v50 = vsub.f32 %v410_v24, %v462_v48  ;;  %v482_v51 = vsel %vm438_vm2, %v475_v49, 0.0  ;;  %1402 = vmatprep.subr.bf16.mxu1 %v1640_v3  ;;  %v567_v24 = vld [vmem:[%s2050_s3 + $0x28] sm:$0xff] }
 0x183   : > { %v453_v52 = vpop.xlane.xlu0 %452  ;;  %v447_v53 = vpop.xlane.xlu1 %446  ;;  %483 = vadd.xlane.f32.xlu1 %v482_v51  ;;  %v1406_v25 = vpack.c.bf16 %v567_v24, %v566_v23  ;;  %v1217_v51 = vld [vmem:[%s2049_s2 + $0x2] ss:$0 sm:$0xff] }
 0x184   : > { %v465_v54 = vmul.f32 0.015625, %v453_v52  ;;  %v463_v55 = vmul.f32 0.015625, %v447_v53  ;;  %v476_v56 = vmul.f32 %v1777_v50, %v1777_v50 }
 0x185   : > { %1404 = vmatpush3.bf16.msra.mxu1 %v1403_v22 }
 0x186   : > { %v1782_v57 = vsub.f32 %v425_v26, %v465_v54  ;;  %v1784_v58 = vsub.f32 %v415_v31, %v463_v55  ;;  %v485_v59 = vsel %vm438_vm2, %v476_v56, 0.0  ;;  %1405 = vmatprep.subr.bf16.mxu1 %v1640_v3  ;;  %v568_v26 = vld [vmem:[%s2050_s3 + $0x30] sm:$0xff] }
 0x187   : > { %486 = vadd.xlane.f32.xlu0 %v485_v59  ;;  %v459_v60 = vpop.xlane.xlu0 %458  ;;  %v450_v61 = vpop.xlane.xlu1 %449  ;;  %v1409_v28 = vpack.c.bf16 %v569_v27, %v568_v26 }
 0x188   : > { %v467_v62 = vmul.f32 0.015625, %v459_v60  ;;  %v464_v63 = vmul.f32 0.015625, %v450_v61  ;;  %v477_v0 = vmul.f32 %v1784_v58, %v1784_v58  ;;  %v479_v5 = vmul.f32 %v1782_v57, %v1782_v57 }
 0x189   : > { %1407 = vmatpush3.bf16.msra.mxu1 %v1406_v25  ;;  %v1218_v25 = vld [vmem:[%s2051_s4] ss:$0 sm:$0xff] }
 0x18a   : > { %v1789_v1 = vsub.f32 %v435_v33, %v467_v62  ;;  %v1791_v2 = vsub.f32 %v420_v39, %v464_v63  ;;  %v488_v4 = vsel %vm438_vm2, %v477_v0, 0.0  ;;  %v494_v11 = vsel %vm438_vm2, %v479_v5, 0.0  ;;  %1408 = vmatprep.subr.bf16.mxu1 %v1640_v3 }
 0x18b   : > { %489 = vadd.xlane.f32.xlu1 %v488_v4  ;;  %v456_v7 = vpop.xlane.xlu1 %455 }
 0x18c   : > { %v466_v8 = vmul.f32 0.015625, %v456_v7  ;;  %v478_v9 = vmul.f32 %v1791_v2, %v1791_v2  ;;  %v481_v13 = vmul.f32 %v1789_v1, %v1789_v1 }
 0x18d   : > { %1410 = vmatpush3.bf16.msra.mxu1 %v1409_v28 }
 0x18e   : > { %v1798_v10 = vsub.f32 %v430_v38, %v466_v8  ;;  %v491_v12 = vsel %vm438_vm2, %v478_v9, 0.0  ;;  %v500_v15 = vsel %vm438_vm2, %v481_v13, 0.0 }
 0x18f   : > { %495 = vadd.xlane.f32.xlu1 %v494_v11  ;;  %492 = vadd.xlane.f32.xlu0 %v491_v12 }
 0x190   : > { %v480_v14 = vmul.f32 %v1798_v10, %v1798_v10 }
 0x192   : > { %v497_v16 = vsel %vm438_vm2, %v480_v14, 0.0 }
 0x193   : > { %501 = vadd.xlane.f32.xlu1 %v500_v15  ;;  %498 = vadd.xlane.f32.xlu0 %v497_v16 }
 0x210   : > { %v484_v29 = vpop.xlane.xlu1 %483 }
 0x211   : > { %v503_v30 = vmul.f32 0.015625, %v484_v29 }
 0x213   : > { %v510_v31 = vadd.f32 1e-05, %v503_v30 }
 0x214   : > { %v487_v32 = vpop.xlane.xlu0 %486 }
 0x215   : > { %1520 = vrsqrt.f32 %v510_v31  ;;  %v504_v33 = vmul.f32 0.015625, %v487_v32 }
 0x217   : > { %v511_v34 = vadd.f32 1e-05, %v504_v33 }
 0x218   : > { %v490_v35 = vpop.xlane.xlu1 %489 }
 0x219   : > { %1522 = vrsqrt.f32 %v511_v34  ;;  %v505_v36 = vmul.f32 0.015625, %v490_v35 }
 0x21b   : > { %v512_v37 = vadd.f32 1e-05, %v505_v36 }
 0x21c   : > { %v493_v38 = vpop.xlane.xlu0 %492  ;;  %v496_v39 = vpop.xlane.xlu1 %495 }
 0x21d   : > { %1524 = vrsqrt.f32 %v512_v37  ;;  %v506_v40 = vmul.f32 0.015625, %v493_v38  ;;  %v507_v41 = vmul.f32 0.015625, %v496_v39 }
 0x21f   : > { %v1521_v42 = vpop.eup %1520  ;;  %v513_v44 = vadd.f32 1e-05, %v506_v40  ;;  %v514_v45 = vadd.f32 1e-05, %v507_v41 }
 0x220   : > { %v524_v47 = vmul.f32 %v1521_v42, %v1773_v46  ;;  %v499_v48 = vpop.xlane.xlu0 %498  ;;  %v502_v49 = vpop.xlane.xlu1 %501 }
 0x221   : > { %1526 = vrsqrt.f32 %v513_v44  ;;  %v508_v52 = vmul.f32 0.015625, %v499_v48  ;;  %v509_v53 = vmul.f32 0.015625, %v502_v49 }
 0x222   : > { %v536_v54 = vmul.f32 %v1216_v43, %v524_v47  ;;  %1528 = vrsqrt.f32 %v514_v45 }
 0x223   : > { %v1523_v55 = vpop.eup %1522  ;;  %v515_v56 = vadd.f32 1e-05, %v508_v52  ;;  %v516_v59 = vadd.f32 1e-05, %v509_v53 }
 0x224   : > { %v548_v60 = vadd.f32 %v1217_v51, %v536_v54  ;;  %v525_v61 = vmul.f32 %v1523_v55, %v1777_v50 }
 0x225   : > { %1530 = vrsqrt.f32 %v515_v56 }
 0x226   : > { %v555_v62 = vmax.f32 %v548_v60, 0.0  ;;  %1532 = vrsqrt.f32 %v516_v59  ;;  %v537_v46 = vmul.f32 %v1216_v43, %v525_v61 }
 0x227   : > { %v1525_v63 = vpop.eup %1524 }
 0x228   : > { %1336 = vmatmul.mubr.msk.f32.vlgmr.msra.gmra.mrb[6].mxu1 %vm438_vm2, %v555_v62  ;;  %v549_v0 = vadd.f32 %v1217_v51, %v537_v46  ;;  %v526_v4 = vmul.f32 %v1525_v63, %v1784_v58 }
 0x229   : > { %1338 = vmatprep.mubr.msk.f32.mxu1 %vm1641_vm0, %v1642_v6 }
 0x22a   : > { %v556_v5 = vmax.f32 %v549_v0, 0.0  ;;  %v538_v7 = vmul.f32 %v1216_v43, %v526_v4 }
 0x22b   : > { %v1527_v8 = vpop.eup %1526 }
 0x22c   : > { %v1529_v9 = vpop.eup %1528  ;;  %1339 = vmatmul.mubr.msk.f32.gmra.mrb[8].mxu1 %vm438_vm2, %v556_v5  ;;  %v550_v50 = vadd.f32 %v1217_v51, %v538_v7  ;;  %v527_v11 = vmul.f32 %v1527_v8, %v1791_v2 }
 0x22d   : > { %1341 = vmatprep.mubr.msk.f32.mxu1 %vm1641_vm0, %v1642_v6  ;;  %v528_v12 = vmul.f32 %v1529_v9, %v1782_v57 }
 0x22e   : > { %v557_v13 = vmax.f32 %v550_v50, 0.0  ;;  %v539_v14 = vmul.f32 %v1216_v43, %v527_v11 }
 0x22f   : > { %v1531_v58 = vpop.eup %1530  ;;  %v540_v15 = vmul.f32 %v1216_v43, %v528_v12 }
 0x230   : > { %v1533_v16 = vpop.eup %1532  ;;  %1342 = vmatmul.mubr.msk.f32.gmra.mrb[10].mxu1 %vm438_vm2, %v557_v13  ;;  %v551_v17 = vadd.f32 %v1217_v51, %v539_v14  ;;  %v529_v18 = vmul.f32 %v1531_v58, %v1798_v10 }
 0x231   : > { %1344 = vmatprep.mubr.msk.f32.mxu1 %vm1641_vm0, %v1642_v6  ;;  %v552_v2 = vadd.f32 %v1217_v51, %v540_v15  ;;  %v530_v21 = vmul.f32 %v1533_v16, %v1789_v1 }
 0x232   : > { %v558_v19 = vmax.f32 %v551_v17, 0.0  ;;  %v541_v20 = vmul.f32 %v1216_v43, %v529_v18 }
 0x233   : > { %v559_v57 = vmax.f32 %v552_v2, 0.0  ;;  %v542_v23 = vmul.f32 %v1216_v43, %v530_v21 }
 0x234   : > { %1345 = vmatmul.mubr.msk.f32.gmra.mrb[12].mxu1 %vm438_vm2, %v558_v19  ;;  %v553_v22 = vadd.f32 %v1217_v51, %v541_v20 }
 0x235   : > { %1347 = vmatprep.mubr.msk.f32.mxu1 %vm1641_vm0, %v1642_v6  ;;  %v554_v24 = vadd.f32 %v1217_v51, %v542_v23 }
 0x236   : > { %v560_v10 = vmax.f32 %v553_v22, 0.0 }
 0x237   : > { %v561_v1 = vmax.f32 %v554_v24, 0.0 }
 0x238   : > { %1348 = vmatmul.mubr.msk.f32.gmra.mrb[14].mxu1 %vm438_vm2, %v559_v57 }
 0x239   : > { %1350 = vmatprep.mubr.msk.f32.mxu1 %vm1641_vm0, %v1642_v6 }
 0x23c   : > { %1351 = vmatmul.mubr.msk.f32.gmra.mrb[16].mxu1 %vm438_vm2, %v560_v10 }
 0x23d   : > { %1353 = vmatprep.mubr.msk.f32.mxu1 %vm1641_vm0, %v1642_v6 }
 0x240   : > { %1354 = vmatmul.mubr.msk.f32.gmra.mrb[18].mxu1 %vm438_vm2, %v561_v1 }
 0x2fb   : > { %v662_v26 = vpop.f32.mrb[6].mxu1 }
 0x2fc   : > { %v663_v27 = vadd.f32 %v1218_v25, %v662_v26  ;;  %v1337_v28 = vpop.f32.mrb[7].mxu1  ;;  %v819_v26 = vld [vmem:[%s2052_s5 + $0x8] sm:$0xff] }
 0x2fe   : > { %v696_v29 = vsel %vm438_vm2, %v663_v27, 0.0 }
 0x2ff   : > { %697 = vadd.xlane.f32.xlu0 %v696_v29  ;;  %v667_v30 = vpop.f32.mrb[8].mxu1 }
 0x300   : > { %v668_v31 = vadd.f32 %v1218_v25, %v667_v30  ;;  %v1340_v32 = vpop.f32.mrb[9].mxu1  ;;  %v820_v30 = vld [vmem:[%s2052_s5 + $0x10] sm:$0xff] }
 0x302   : > { %v699_v33 = vsel %vm438_vm2, %v668_v31, 0.0 }
 0x303   : > { %700 = vadd.xlane.f32.xlu1 %v699_v33  ;;  %v672_v34 = vpop.f32.mrb[10].mxu1  ;;  %v822_v33 = vld [vmem:[%s2052_s5 + $0x20] sm:$0xff] }
 0x304   : > { %v673_v35 = vadd.f32 %v1218_v25, %v672_v34  ;;  %v1343_v36 = vpop.f32.mrb[11].mxu1  ;;  %v823_v34 = vld [vmem:[%s2052_s5 + $0x28] sm:$0xff] }
 0x305   : > { %v824_v36 = vld [vmem:[%s2052_s5 + $0x30] sm:$0xff] }
 0x306   : > { %v702_v37 = vsel %vm438_vm2, %v673_v35, 0.0 }
 0x307   : > { %703 = vadd.xlane.f32.xlu0 %v702_v37  ;;  %v677_v38 = vpop.f32.mrb[12].mxu1  ;;  %v825_v37 = vld [vmem:[%s2052_s5 + $0x38] sm:$0xff] }
 0x308   : > { %v678_v39 = vadd.f32 %v1218_v25, %v677_v38  ;;  %v1346_v40 = vpop.f32.mrb[13].mxu1  ;;  %v1421_v38 = vpack.c.bf16 %v825_v37, %v824_v36 }
 0x30a   : > { %v705_v41 = vsel %vm438_vm2, %v678_v39, 0.0 }
 0x30b   : > { %706 = vadd.xlane.f32.xlu1 %v705_v41  ;;  %v682_v42 = vpop.f32.mrb[14].mxu1 }
 0x30c   : > { %v683_v43 = vadd.f32 %v1218_v25, %v682_v42  ;;  %v1349_v44 = vpop.f32.mrb[15].mxu1 }
 0x30e   : > { %v708_v45 = vsel %vm438_vm2, %v683_v43, 0.0 }
 0x30f   : > { %709 = vadd.xlane.f32.xlu0 %v708_v45  ;;  %v687_v47 = vpop.f32.mrb[16].mxu1 }
 0x310   : > { %v688_v48 = vadd.f32 %v1218_v25, %v687_v47  ;;  %v1352_v49 = vpop.f32.mrb[17].mxu1 }
 0x312   : > { %v711_v51 = vsel %vm438_vm2, %v688_v48, 0.0 }
 0x313   : > { %712 = vadd.xlane.f32.xlu1 %v711_v51  ;;  %v692_v52 = vpop.f32.mrb[18].mxu1 }
 0x314   : > { %v693_v53 = vadd.f32 %v1218_v25, %v692_v52  ;;  %v1355_v54 = vpop.f32.mrb[19].mxu1  ;;  %v818_v25 = vld [vmem:[%s2052_s5] sm:$0xff] }
 0x315   : > { %v1412_v28 = vpack.c.bf16 %v819_v26, %v818_v25  ;;  %v1226_v52 = vld [vmem:[%s2051_s4 + $0x1] ss:$0 sm:$0xff] }
 0x316   : > { %v714_v55 = vsel %vm438_vm2, %v693_v53, 0.0 }
 0x317   : > { %715 = vadd.xlane.f32.xlu0 %v714_v55  ;;  %1413 = vmatpush3.bf16.msra.mxu0 %v1412_v28 }
 0x318   : > { %1414 = vmatprep.subr.bf16.mxu0 %v1640_v3 }
 0x38c   : > { %v698_v56 = vpop.xlane.xlu0 %697 }
 0x38d   : > { %v717_v59 = vmul.f32 0.015625, %v698_v56  ;;  %v1227_v56 = vld [vmem:[%s2051_s4 + $0x2] ss:$0 sm:$0xff] }
 0x38f   : > { %v1877_v60 = vsub.f32 %v663_v27, %v717_v59 }
 0x390   : > { %v701_v61 = vpop.xlane.xlu1 %700 }
 0x391   : > { %v718_v62 = vmul.f32 0.015625, %v701_v61  ;;  %v731_v46 = vmul.f32 %v1877_v60, %v1877_v60 }
 0x393   : > { %v1881_v63 = vsub.f32 %v668_v31, %v718_v62  ;;  %v738_v0 = vsel %vm438_vm2, %v731_v46, 0.0  ;;  %v821_v31 = vld [vmem:[%s2052_s5 + $0x18] sm:$0xff] }
 0x394   : > { %v704_v4 = vpop.xlane.xlu0 %703  ;;  %739 = vadd.xlane.f32.xlu1 %v738_v0  ;;  %v1415_v32 = vpack.c.bf16 %v821_v31, %v820_v30 }
 0x395   : > { %v719_v5 = vmul.f32 0.015625, %v704_v4  ;;  %v732_v7 = vmul.f32 %v1881_v63, %v1881_v63 }
 0x396   : > { %1416 = vmatpush3.bf16.msra.mxu0 %v1415_v32 }
 0x397   : > { %v1886_v8 = vsub.f32 %v673_v35, %v719_v5  ;;  %v741_v9 = vsel %vm438_vm2, %v732_v7, 0.0  ;;  %1417 = vmatprep.subr.bf16.mxu0 %v1640_v3  ;;  %v1418_v35 = vpack.c.bf16 %v823_v34, %v822_v33 }
 0x398   : > { %742 = vadd.xlane.f32.xlu0 %v741_v9  ;;  %v707_v50 = vpop.xlane.xlu1 %706 }
 0x399   : > { %v720_v11 = vmul.f32 0.015625, %v707_v50  ;;  %v733_v12 = vmul.f32 %v1886_v8, %v1886_v8 }
 0x39a   : > { %1419 = vmatpush3.bf16.msra.mxu0 %v1418_v35 }
 0x39b   : > { %v1891_v13 = vsub.f32 %v678_v39, %v720_v11  ;;  %v744_v14 = vsel %vm438_vm2, %v733_v12, 0.0  ;;  %1420 = vmatprep.subr.bf16.mxu0 %v1640_v3 }
 0x39c   : > { %v710_v58 = vpop.xlane.xlu0 %709  ;;  %745 = vadd.xlane.f32.xlu1 %v744_v14 }
 0x39d   : > { %v721_v15 = vmul.f32 0.015625, %v710_v58  ;;  %v734_v16 = vmul.f32 %v1891_v13, %v1891_v13 }
 0x39e   : > { %1422 = vmatpush3.bf16.msra.mxu0 %v1421_v38 }
 0x39f   : > { %v1896_v17 = vsub.f32 %v683_v43, %v721_v15  ;;  %v747_v18 = vsel %vm438_vm2, %v734_v16, 0.0 }
 0x3a0   : > { %748 = vadd.xlane.f32.xlu0 %v747_v18  ;;  %v713_v19 = vpop.xlane.xlu1 %712 }
 0x3a1   : > { %v722_v2 = vmul.f32 0.015625, %v713_v19  ;;  %v735_v20 = vmul.f32 %v1896_v17, %v1896_v17 }
 0x3a3   : > { %v1901_v21 = vsub.f32 %v688_v48, %v722_v2  ;;  %v750_v57 = vsel %vm438_vm2, %v735_v20, 0.0 }
 0x3a4   : > { %751 = vadd.xlane.f32.xlu1 %v750_v57  ;;  %v716_v22 = vpop.xlane.xlu0 %715 }
 0x3a5   : > { %v723_v23 = vmul.f32 0.015625, %v716_v22  ;;  %v736_v10 = vmul.f32 %v1901_v21, %v1901_v21 }
 0x3a7   : > { %v1906_v24 = vsub.f32 %v693_v53, %v723_v23  ;;  %v753_v1 = vsel %vm438_vm2, %v736_v10, 0.0 }
 0x3a8   : > { %754 = vadd.xlane.f32.xlu0 %v753_v1 }
 0x3a9   : > { %v737_v27 = vmul.f32 %v1906_v24, %v1906_v24 }
 0x3ab   : > { %v756_v29 = vsel %vm438_vm2, %v737_v27, 0.0 }
 0x3ac   : > { %757 = vadd.xlane.f32.xlu1 %v756_v29 }
 0x421   : > { %v740_v39 = vpop.xlane.xlu1 %739 }
 0x422   : > { %v759_v40 = vmul.f32 0.015625, %v740_v39 }
 0x424   : > { %v766_v41 = vadd.f32 1e-05, %v759_v40 }
 0x425   : > { %v743_v42 = vpop.xlane.xlu0 %742 }
 0x426   : > { %1534 = vrsqrt.f32 %v766_v41  ;;  %v760_v43 = vmul.f32 0.015625, %v743_v42 }
 0x428   : > { %v767_v44 = vadd.f32 1e-05, %v760_v43 }
 0x429   : > { %v746_v45 = vpop.xlane.xlu1 %745 }
 0x42a   : > { %1536 = vrsqrt.f32 %v767_v44  ;;  %v761_v3 = vmul.f32 0.015625, %v746_v45 }
 0x42c   : > { %v768_v47 = vadd.f32 1e-05, %v761_v3 }
 0x42d   : > { %v749_v48 = vpop.xlane.xlu0 %748 }
 0x42e   : > { %1538 = vrsqrt.f32 %v768_v47  ;;  %v762_v49 = vmul.f32 0.015625, %v749_v48 }
 0x430   : > { %v1535_v51 = vpop.eup %1534  ;;  %v769_v53 = vadd.f32 1e-05, %v762_v49 }
 0x431   : > { %v780_v54 = vmul.f32 %v1535_v51, %v1877_v60  ;;  %v752_v55 = vpop.xlane.xlu1 %751 }
 0x432   : > { %1540 = vrsqrt.f32 %v769_v53  ;;  %v763_v59 = vmul.f32 0.015625, %v752_v55 }
 0x433   : > { %v792_v61 = vmul.f32 %v1226_v52, %v780_v54 }
 0x434   : > { %v1537_v62 = vpop.eup %1536  ;;  %v770_v46 = vadd.f32 1e-05, %v763_v59 }
 0x435   : > { %v804_v0 = vadd.f32 %v1227_v56, %v792_v61  ;;  %v755_v4 = vpop.xlane.xlu0 %754  ;;  %v781_v5 = vmul.f32 %v1537_v62, %v1881_v63 }
 0x436   : > { %1542 = vrsqrt.f32 %v770_v46  ;;  %v764_v7 = vmul.f32 0.015625, %v755_v4 }
 0x437   : > { %v811_v9 = vmax.f32 %v804_v0, 0.0  ;;  %v793_v50 = vmul.f32 %v1226_v52, %v781_v5 }
 0x438   : > { %v1539_v11 = vpop.eup %1538  ;;  %v771_v60 = vadd.f32 1e-05, %v764_v7 }
 0x439   : > { %1373 = vmatmul.mubr.msk.f32.vlgmr.msra.gmra.mrb[8].mxu0 %vm438_vm2, %v811_v9  ;;  %v758_v12 = vpop.xlane.xlu1 %757  ;;  %v805_v14 = vadd.f32 %v1227_v56, %v793_v50  ;;  %v782_v58 = vmul.f32 %v1539_v11, %v1886_v8 }
 0x43a   : > { %1544 = vrsqrt.f32 %v771_v60  ;;  %v765_v15 = vmul.f32 0.015625, %v758_v12  ;;  %1375 = vmatprep.mubr.msk.f32.mxu0 %vm1641_vm0, %v1642_v6 }
 0x43b   : > { %v812_v16 = vmax.f32 %v805_v14, 0.0  ;;  %v794_v18 = vmul.f32 %v1226_v52, %v782_v58 }
 0x43c   : > { %v1541_v63 = vpop.eup %1540  ;;  %v772_v19 = vadd.f32 1e-05, %v765_v15 }
 0x43d   : > { %1376 = vmatmul.mubr.msk.f32.gmra.mrb[10].mxu0 %vm438_vm2, %v812_v16  ;;  %v806_v2 = vadd.f32 %v1227_v56, %v794_v18  ;;  %v783_v20 = vmul.f32 %v1541_v63, %v1891_v13 }
 0x43e   : > { %1546 = vrsqrt.f32 %v772_v19  ;;  %1378 = vmatprep.mubr.msk.f32.mxu0 %vm1641_vm0, %v1642_v6 }
 0x43f   : > { %v813_v57 = vmax.f32 %v806_v2, 0.0  ;;  %v795_v8 = vmul.f32 %v1226_v52, %v783_v20 }
 0x440   : > { %v1543_v22 = vpop.eup %1542 }
 0x441   : > { %1379 = vmatmul.mubr.msk.f32.gmra.mrb[12].mxu0 %vm438_vm2, %v813_v57  ;;  %v807_v23 = vadd.f32 %v1227_v56, %v795_v8  ;;  %v784_v10 = vmul.f32 %v1543_v22, %v1896_v17 }
 0x442   : > { %1381 = vmatprep.mubr.msk.f32.mxu0 %vm1641_vm0, %v1642_v6 }
 0x443   : > { %v814_v1 = vmax.f32 %v807_v23, 0.0  ;;  %v796_v25 = vmul.f32 %v1226_v52, %v784_v10 }
 0x444   : > { %v1545_v26 = vpop.eup %1544 }
 0x445   : > { %v785_v13 = vmul.f32 %v1545_v26, %v1901_v21  ;;  %1382 = vmatmul.mubr.msk.f32.gmra.mrb[14].mxu0 %vm438_vm2, %v814_v1  ;;  %v808_v27 = vadd.f32 %v1227_v56, %v796_v25 }
 0x446   : > { %1384 = vmatprep.mubr.msk.f32.mxu0 %vm1641_vm0, %v1642_v6 }
 0x447   : > { %v815_v28 = vmax.f32 %v808_v27, 0.0  ;;  %v797_v29 = vmul.f32 %v1226_v52, %v785_v13 }
 0x448   : > { %v1547_v30 = vpop.eup %1546 }
 0x449   : > { %v786_v17 = vmul.f32 %v1547_v30, %v1906_v24  ;;  %1385 = vmatmul.mubr.msk.f32.gmra.mrb[16].mxu0 %vm438_vm2, %v815_v28  ;;  %v809_v31 = vadd.f32 %v1227_v56, %v797_v29  ;;  %v1228_v24 = vld [vmem:[%s2053_s6] ss:$0 sm:$0xff] }
 0x44a   : > { %1387 = vmatprep.mubr.msk.f32.mxu0 %vm1641_vm0, %v1642_v6 }
 0x44b   : > { %v816_v32 = vmax.f32 %v809_v31, 0.0  ;;  %v798_v21 = vmul.f32 %v1226_v52, %v786_v17 }
 0x44d   : > { %1388 = vmatmul.mubr.msk.f32.gmra.mrb[18].mxu0 %vm438_vm2, %v816_v32  ;;  %v810_v33 = vadd.f32 %v1227_v56, %v798_v21 }
 0x44e   : > { %1390 = vmatprep.mubr.msk.f32.mxu0 %vm1641_vm0, %v1642_v6 }
 0x44f   : > { %v817_v34 = vmax.f32 %v810_v33, 0.0 }
 0x451   : > { %1391 = vmatmul.mubr.msk.f32.gmra.mrb[20].mxu0 %vm438_vm2, %v817_v34 }
 0x50c   : > { %v920_v35 = vpop.f32.mrb[8].mxu0 }
 0x50d   : > { %v921_v36 = vadd.f32 %v1228_v24, %v920_v35  ;;  %v1374_v37 = vpop.f32.mrb[9].mxu0 }
 0x50f   : > { %955 = vst.msk [vmem:[%s1975_s26] sm:$0xff] %vm954_vm3, %v921_v36 }
 0x510   : > { %v925_v6 = vpop.f32.mrb[10].mxu0 }
 0x511   : > { %v926_v38 = vadd.f32 %v1228_v24, %v925_v6  ;;  %v1377_v39 = vpop.f32.mrb[11].mxu0 }
 0x513   : > { %956 = vst.msk [vmem:[%s1975_s26 + $0x8] sm:$0xff] %vm954_vm3, %v926_v38 }
 0x514   : > { %v930_v40 = vpop.f32.mrb[12].mxu0 }
 0x515   : > { %v931_v41 = vadd.f32 %v1228_v24, %v930_v40  ;;  %v1380_v42 = vpop.f32.mrb[13].mxu0 }
 0x517   : > { %957 = vst.msk [vmem:[%s1975_s26 + $0x10] sm:$0xff] %vm954_vm3, %v931_v41 }
 0x518   : > { %v935_v43 = vpop.f32.mrb[14].mxu0 }
 0x519   : > { %v936_v44 = vadd.f32 %v1228_v24, %v935_v43  ;;  %v1383_v45 = vpop.f32.mrb[15].mxu0 }
 0x51b   : > { %958 = vst.msk [vmem:[%s1975_s26 + $0x18] sm:$0xff] %vm954_vm3, %v936_v44 }
 0x51c   : > { %v940_v3 = vpop.f32.mrb[16].mxu0 }
 0x51d   : > { %v941_v47 = vadd.f32 %v1228_v24, %v940_v3  ;;  %v1386_v48 = vpop.f32.mrb[17].mxu0 }
 0x51f   : > { %959 = vst.msk [vmem:[%s1975_s26 + $0x20] sm:$0xff] %vm954_vm3, %v941_v47 }
 0x520   : > { %v945_v49 = vpop.f32.mrb[18].mxu0 }
 0x521   : > { %v946_v51 = vadd.f32 %v1228_v24, %v945_v49  ;;  %v1389_v52 = vpop.f32.mrb[19].mxu0  ;;  %968 = sbr.rel (!%p1708_p4) target bundleno = 1381 (0x565), region = 52 }
 0x523   : > { %960 = vst.msk [vmem:[%s1975_s26 + $0x28] sm:$0xff] %vm954_vm3, %v946_v51 }
 0x524   : > { %v950_v53 = vpop.f32.mrb[20].mxu0 }
 0x525   : > { %v951_v54 = vadd.f32 %v1228_v24, %v950_v53  ;;  %v1392_v55 = vpop.f32.mrb[21].mxu0 }
 0x527   : > { %961 = vst.msk [vmem:[%s1975_s26 + $0x30] sm:$0xff] %vm954_vm3, %v951_v54 }
 0x528   : > { %s2063_s24 = smov (!%p971_p8, %s970_s24), 7 }
 0x529   : > { %s1236_s12 = sshll.u32 %s2063_s24, 7 }
 0x52a   : > { %p1239_p9 = scmp.eq.s32.totalorder %s1236_s12, 0 }
 0x52b   : > { %1548 = sdivrem.u32 (!%p1239_p9), %s2063_s24, 7 }
 0x52c   : > { %979 = sbr.rel (%p1239_p9) target bundleno = 1381 (0x565), region = 56 }
 0x534   : > { %s2004_s9 = spop.drf %1548 }
 0x535   : > { %p1240_p10 = scmp.le.s32.totalorder %s2004_s9, 0 }
 0x536   : > { %s2056_s27 = smov (!%p1240_p10), %s1998_s11  ;;  %s2057_s18 = smov (!%p1240_p10), %s1975_s26 }
 0x537   : > { %1159 = sbr.rel (%p1240_p10) target bundleno = 1352 (0x548), region = 132  ;;  %s2013_s13 = smov (!%p1240_p10), 0  }
 0x538   : > { %s2015_s14 = smov (!%p1240_p10), 0  }
 0x53e LB: >> { %v1055_v56 = vld [vmem:[%s1614_s18] sm:$0xff]  ;;  %v1057_v59 = vld [vmem:[%s1614_s18 + $0x8] sm:$0xff]  ;;  %v1059_v61 = vld [vmem:[%s1614_s18 + $0x10] sm:$0xff]  ;;  %s1069_s15 = sadd.s32 1, %s1618_s13  ;;  %s1049_s14 = sadd.s32 1, %s1622_s14   ;;  %s1622_s14 = sphi %s2015_s14, %s1049_s14   ;;  %s1618_s13 = sphi %s2013_s13, %s2058_s13   ;;  %s1614_s18 = sphi %s2057_s18, %s1074_s18   ;;  %s1610_s27 = sphi %s2056_s27, %s1075_s27  }
 0x53f   : >> { %1056 = vst [vmem:[%s1610_s27] sm:$0xff] %v1055_v56  ;;  %1058 = vst [vmem:[%s1610_s27 + $0x8] sm:$0xff] %v1057_v59  ;;  %v1061_v62 = vld [vmem:[%s1614_s18 + $0x18] sm:$0xff]  ;;  %v1063_v46 = vld [vmem:[%s1614_s18 + $0x20] sm:$0xff]  ;;  %p1070_p11 = scmp.ge.s32.totalorder %s1069_s15, %s2004_s9  ;;  %p1048_p12 = scmp.ge.s32.totalorder %s1049_s14, %s2004_s9 }
 0x540   : >> { %1060 = vst [vmem:[%s1610_s27 + $0x10] sm:$0xff] %v1059_v61  ;;  %v1065_v0 = vld [vmem:[%s1614_s18 + $0x28] sm:$0xff]  ;;  %1062 = vst [vmem:[%s1610_s27 + $0x18] sm:$0xff] %v1061_v62  ;;  %v1067_v4 = vld [vmem:[%s1614_s18 + $0x30] sm:$0xff] }
 0x541   : >> { %1064 = vst [vmem:[%s1610_s27 + $0x20] sm:$0xff] %v1063_v46  ;;  %1066 = vst [vmem:[%s1610_s27 + $0x28] sm:$0xff] %v1065_v0  ;;  %s2065_s15 = smov (%p1070_p11, %s1069_s15), 0  ;;  %1051 = sbr.rel (!%p1048_p12) target bundleno = 1342 (0x53e), region = 138 }
 0x542   : >> { %1068 = vst [vmem:[%s1610_s27 + $0x30] sm:$0xff] %v1067_v4  ;;  %s1072_s16 = smul.u32 56, %s2065_s15  ;;  %s2058_s13 = smov %s2065_s15 }
 0x544   : >> { %s1074_s18 = scalar_lea.vmem %s1975_s26, %s1072_s16 [#allocation2]   ;;  %s1075_s27 = scalar_lea.vmem %s1998_s11, %s1072_s16  }
 0x548 PF: > { %1550 = sdivrem.u32 %s2063_s24, 7 }
 0x549   : > { %s1241_s17 = smul.u32 56, %s2004_s9 }
 0x54b   : > { %s1080_s19 = scalar_lea.vmem %s1975_s26, %s1241_s17 [#allocation2]   ;;  %s1082_s20 = scalar_lea.vmem %s1998_s11, %s1241_s17  }
 0x551   : > { %s1551_s21 = spop.drf %1550 }
 0x552   : > { %p1243_p13 = scmp.le.s32.totalorder %s1551_s21, 0 }
 0x553   : > { %s1624_s22 = smov (!%p1243_p13), %s1082_s20   ;;  %s1628_s23 = smov (!%p1243_p13), %s1080_s19  }
 0x554   : > { %1173 = sbr.rel (%p1243_p13) target bundleno = 1381 (0x565), region = 143  ;;  %s1632_s29 = smov (!%p1243_p13), 0  }
 0x555   : > { %s1636_s30 = smov (!%p1243_p13), 0  }
 0x55b LB: >> { %v1092_v5 = vld [vmem:[%s1630_s23] sm:$0xff]  ;;  %s1094_s10 = sadd.s32 1, %s1634_s29  ;;  %s1086_s30 = sadd.s32 1, %s1638_s30   ;;  %s1638_s30 = sphi %s1636_s30, %s1086_s30   ;;  %s1634_s29 = sphi %s1632_s29, %s1633_s29   ;;  %s1630_s23 = sphi %s1628_s23, %s1099_s23   ;;  %s1626_s22 = sphi %s1624_s22, %s1100_s22  }
 0x55c   : >> { %1093 = vst [vmem:[%s1626_s22] sm:$0xff] %v1092_v5  ;;  %p1095_p0 = scmp.ge.s32.totalorder %s1094_s10, %s1551_s21  ;;  %p1085_p1 = scmp.ge.s32.totalorder %s1086_s30, %s1551_s21 }
 0x55e   : >> { %s2067_s10 = smov (%p1095_p0, %s1094_s10), 0  ;;  %1088 = sbr.rel (!%p1085_p1) target bundleno = 1371 (0x55b), region = 149 }
 0x55f   : >> { %s1244_s26 = sshll.u32 %s2067_s10, 3  ;;  %s1633_s29 = smov %s2067_s10  }
 0x560   : >> { %s1099_s23 = scalar_lea.vmem %s1080_s19, %s1244_s26 [#allocation2]   ;;  %s1100_s22 = scalar_lea.vmem %s1082_s20, %s1244_s26  }
 0x565 PF: > { %p14_p2 = scmp.ge.s32.totalorder %s1698_s28, 4   ;;  %s2059_s24 = smov %s1602_s25 }
 0x566   : > { %s2060_s25 = smov %s1706_s8  ;;  %s2061_s26 = smov %s1698_s28 }
 0x567   :  { %16 = sbr.rel (!%p14_p2) target bundleno = 2 (0x2), region = 160 }

</bundles_post_ra>
